<compile_context>
chip_gen: v7x
topology: tpu7x:2x2x1
jax: 0.10.0
libtpu: 0.0.40
codegen_flags: <defaults>
</compile_context>

<pallas_src>
import functools
import math

import jax
import jax.numpy as jnp
from jax.experimental import pallas as pl
from jax.experimental.pallas import tpu as pltpu

HIDDEN1 = 128   # hidden_size in the reference
HIDDEN2 = 32
NUM_INPUT = 3   # Pendulum-v1 observation_space.shape[0]
NUM_OUTPUT = 1  # Pendulum-v1 action_space.shape[0]
assert NUM_OUTPUT == 1, "slab packing / fused output layout assumes a single action dim"

_LOG_SQRT_2PI = 0.5 * math.log(2.0 * math.pi)

# Packed (144, 128) f32 parameter operand layout (single DMA, VMEM-resident):
_ROW_W1 = 0                     # rows 0..7   : fc1 weight padded (8,128); rows 3..7 zero
_ROW_B1 = 8                     # row 8       : fc1 bias (128,)
_ROW_B2 = 9                     # row 9       : fc2 bias, lanes 0..31 (rest 0)
_ROW_WM = 10                    # row 10      : mean_layer weight, lanes 0..31 (rest 0)
_ROW_SC = 11                    # row 11      : lane 0 = mean_layer bias, lane 1 = log_std
_ROW_W2 = 16                    # rows 16..143: fc2 weight padded (128,128); lanes 32+ zero
_P_ROWS = _ROW_W2 + HIDDEN1     # 144 rows (multiple of 8)

_KPAD = 8                       # fc1 contraction dim padded 3 -> 8 (MXU-friendly)
_EPS_LANE = NUM_INPUT           # lane 3 of the per-sample tile carries the normal noise


def _reinforce_kernel(xin_ref, p_ref, out_ref):
    # xin_ref : (TB, 8)    lanes 0..2 = obs, lane 3 = eps, lanes 4..7 = 0
    # p_ref   : (144, 128) packed parameters (constant index_map -> VMEM-resident)
    # out_ref : (TB, 128)  lane 0 = action, lane 1 = log_prob (lane-dense store)
    x8 = xin_ref[...]                                            # (TB, 8)

    # fc1 + ReLU on the MXU: (TB,8)@(8,128). Padded fc1 rows 3..7 are zero, so the
    # eps lane contributes nothing here.
    w1 = p_ref[_ROW_W1:_ROW_W1 + _KPAD, :]                       # (8, 128)
    b1 = p_ref[_ROW_B1:_ROW_B1 + 1, :]                           # (1, 128)
    h1 = jnp.maximum(
        jnp.dot(x8, w1, preferred_element_type=jnp.float32) + b1, 0.0)   # (TB, 128)

    # fc2 + tanh on the MXU: (TB,128)@(128,128). Padded fc2 lanes 32..127 are zero
    # (and so is b2 there) -> h2 lanes 32..127 = tanh(0) = 0.
    w2 = p_ref[_ROW_W2:_ROW_W2 + HIDDEN1, :]                     # (128, 128)
    b2 = p_ref[_ROW_B2:_ROW_B2 + 1, :]                           # (1, 128)
    h2 = jnp.tanh(
        jnp.dot(h1, w2, preferred_element_type=jnp.float32) + b2)        # (TB, 128)

    # mean_layer (out dim 1): lane-wise product + cross-lane reduction (XLU).
    wm = p_ref[_ROW_WM:_ROW_WM + 1, :]                           # (1, 128), lanes 32+ zero
    bm = p_ref[_ROW_SC:_ROW_SC + 1, 0:1]                         # (1, 1)
    log_std = p_ref[_ROW_SC:_ROW_SC + 1, 1:2]                    # (1, 1)
    mean = 3.0 * jnp.tanh(jnp.sum(h2 * wm, axis=1, keepdims=True) + bm)  # (TB, 1)

    # Normal(mean, sigma) sample / log_prob with externally supplied eps.
    sigma = jnp.exp(log_std)                                     # (1, 1)
    eps = x8[:, _EPS_LANE:_EPS_LANE + 1]                         # (TB, 1)
    action = mean + sigma * eps
    # z = (action - mean) / sigma == eps exactly for the action sampled in this call;
    # do NOT reuse this shortcut to score stored/external actions.
    log_prob = -0.5 * (eps * eps) - log_std - _LOG_SQRT_2PI      # (TB, 1)

    # Single fused lane-dense (unmasked) store: lane 0 = action, lane 1 = log_prob.
    lane = jax.lax.broadcasted_iota(jnp.int32, out_ref.shape, 1)
    out_ref[...] = jnp.where(lane == 0, action,
                             jnp.where(lane == 1, log_prob, 0.0))


def init_params(key):
    """Deterministic init mimicking nn.Linear defaults (U[-1/sqrt(fan_in), +])."""
    k1, k2, k3, k4, k5, k6 = jax.random.split(key, 6)

    def lin(kw, kb, fan_in, fan_out):
        bound = 1.0 / math.sqrt(fan_in)
        w = jax.random.uniform(kw, (fan_in, fan_out), jnp.float32, -bound, bound)
        b = jax.random.uniform(kb, (1, fan_out), jnp.float32, -bound, bound)
        return w, b

    w1, b1 = lin(k1, k2, NUM_INPUT, HIDDEN1)
    w2, b2 = lin(k3, k4, HIDDEN1, HIDDEN2)
    wm, bm = lin(k5, k6, HIDDEN2, NUM_OUTPUT)
    return {
        "w1": w1, "b1": b1,          # (3,128), (1,128)
        "w2": w2, "b2": b2,          # (128,32), (1,32)
        "wm": wm, "bm": bm,          # (32,1),  (1,1)
        "log_std": jnp.zeros((1, NUM_OUTPUT), jnp.float32),
    }


def pack_params(params):
    """Pack ALL parameters into a single (144,128) f32 operand (done once)."""
    p = jnp.zeros((_P_ROWS, HIDDEN1), jnp.float32)
    p = p.at[_ROW_W1:_ROW_W1 + NUM_INPUT, :].set(params["w1"])
    p = p.at[_ROW_B1, :].set(params["b1"].reshape(HIDDEN1))
    p = p.at[_ROW_B2, 0:HIDDEN2].set(params["b2"].reshape(HIDDEN2))
    p = p.at[_ROW_WM, 0:HIDDEN2].set(params["wm"].reshape(HIDDEN2))
    p = p.at[_ROW_SC, 0].set(params["bm"][0, 0])
    p = p.at[_ROW_SC, 1].set(params["log_std"][0, 0])
    p = p.at[_ROW_W2:_ROW_W2 + HIDDEN1, 0:HIDDEN2].set(params["w2"])
    return p


def _round_up(x, m):
    return ((x + m - 1) // m) * m


@functools.partial(jax.jit, static_argnames=("tb",))
def reinforce_forward_batched(obs, noise, packed_params, *, tb=128):
    """Batched forward. obs: (B, 3) f32, noise: (B, 1) standard-normal samples.

    Returns (action, log_prob), each (B, 1) f32.
    """
    b = obs.shape[0]
    tb = min(_round_up(tb, 8), _round_up(b, 8))          # tile rows: multiple of 8
    b_pad = _round_up(b, tb)

    # Per-sample data packed into one tiny (B_pad, 8) operand: obs | eps | zeros.
    xin = jnp.zeros((b_pad, _KPAD), jnp.float32)
    xin = xin.at[:b, 0:NUM_INPUT].set(obs.astype(jnp.float32).reshape(b, NUM_INPUT))
    xin = xin.at[:b, _EPS_LANE].set(noise.astype(jnp.float32).reshape(b))

    out = pl.pallas_call(
        _reinforce_kernel,
        out_shape=jax.ShapeDtypeStruct((b_pad, 128), jnp.float32),
        grid=(b_pad // tb,),
        in_specs=[
            pl.BlockSpec((tb, _KPAD), lambda i: (i, 0)),         # per-sample obs+eps
            pl.BlockSpec((_P_ROWS, 128), lambda i: (0, 0)),      # weights: VMEM-resident
        ],
        out_specs=pl.BlockSpec((tb, 128), lambda i: (i, 0)),     # fused lane-dense output
        compiler_params=pltpu.CompilerParams(
            dimension_semantics=("parallel",)),                  # shard batch across TCs
    )(xin, packed_params)

    action = out[:b, 0:NUM_OUTPUT]
    log_prob = out[:b, NUM_OUTPUT:2 * NUM_OUTPUT]
    return action, log_prob


def reinforce_forward(obs, packed_params, noise):
    """Single-observation forward matching ReinforceModel.forward exactly.

    obs: (num_input,) f32; noise: (1, num_output) standard-normal sample.
    Returns (action, log_prob), each (1, num_output).
    """
    return reinforce_forward_batched(
        jnp.asarray(obs, jnp.float32).reshape(1, NUM_INPUT),
        jnp.asarray(noise, jnp.float32).reshape(1, NUM_OUTPUT),
        packed_params, tb=8)


if __name__ == "__main__":
    key = jax.random.PRNGKey(0)
    k_params, k_obs, k_noise, k_obs1, k_noise1 = jax.random.split(key, 5)

    params = init_params(k_params)
    packed = pack_params(params)

    def reference(obs2d, noise2d):
        h1 = jnp.maximum(obs2d @ params["w1"] + params["b1"], 0.0)
        h2 = jnp.tanh(h1 @ params["w2"] + params["b2"])
        mean = 3.0 * jnp.tanh(h2 @ params["wm"] + params["bm"])
        sigma = jnp.exp(params["log_std"])
        action = mean + sigma * noise2d
        log_prob = -0.5 * noise2d * noise2d - params["log_std"] - _LOG_SQRT_2PI
        return action, log_prob

    # --- single-observation path (exact module.forward semantics) ---
    obs1 = jax.random.normal(k_obs1, (NUM_INPUT,), jnp.float32)
    noise1 = jax.random.normal(k_noise1, (1, NUM_OUTPUT), jnp.float32)
    a1, lp1 = reinforce_forward(obs1, packed, noise1)
    jax.block_until_ready((a1, lp1))
    ra1, rlp1 = reference(obs1[None, :], noise1)
    assert a1.shape == (1, NUM_OUTPUT) and lp1.shape == (1, NUM_OUTPUT)
    assert jnp.allclose(a1, ra1, rtol=1e-3, atol=1e-3), (a1, ra1)
    assert jnp.allclose(lp1, rlp1, rtol=1e-3, atol=1e-3), (lp1, rlp1)

    # --- batched path (amortizes launch/DMA cost, feeds the MXU, 2 grid steps) ---
    B = 64
    obs = jax.random.normal(k_obs, (B, NUM_INPUT), jnp.float32)
    noise = jax.random.normal(k_noise, (B, NUM_OUTPUT), jnp.float32)
    act, logp = reinforce_forward_batched(obs, noise, packed, tb=32)
    jax.block_until_ready((act, logp))
    ra, rlp = reference(obs, noise)
    assert act.shape == (B, NUM_OUTPUT) and logp.shape == (B, NUM_OUTPUT)
    assert jnp.allclose(act, ra, rtol=1e-3, atol=1e-3), float(jnp.abs(act - ra).max())
    assert jnp.allclose(logp, rlp, rtol=1e-3, atol=1e-3), float(jnp.abs(logp - rlp).max())

    print("KERNEL_OK")
</pallas_src>

<mosaic_0001>
module attributes {stable_mosaic.version = 11 : i64} {
  func.func @_reinforce_kernel(%arg0: i32, %arg1: memref<8x8xf32, #tpu.memory_space<vmem>>, %arg2: memref<144x128xf32, #tpu.memory_space<vmem>>, %arg3: memref<8x128xf32, #tpu.memory_space<vmem>>) attributes {dimension_semantics = [#tpu.dimension_semantics<parallel>], iteration_bounds = array<i64: 1>, scalar_prefetch = 0 : i64, scratch_operands = 0 : i64, tpu.core_type = #tpu.core_type<tc>, window_params = [{transform_indices = @transform_0, window_bounds = array<i64: 8, 8>}, {pipeline_mode = #tpu.pipeline_mode<synchronous>, transform_indices = @transform_1, window_bounds = array<i64: 144, 128>}, {transform_indices = @transform_2, window_bounds = array<i64: 8, 128>}]} {
    %c0 = arith.constant 0 : index
    %c0_0 = arith.constant 0 : index
    %0 = vector.load %arg1[%c0, %c0_0] : memref<8x8xf32, #tpu.memory_space<vmem>>, vector<8x8xf32>
    %c0_1 = arith.constant 0 : index
    %c0_2 = arith.constant 0 : index
    %1 = vector.load %arg2[%c0_1, %c0_2] : memref<144x128xf32, #tpu.memory_space<vmem>>, vector<8x128xf32>
    %c8 = arith.constant 8 : index
    %c0_3 = arith.constant 0 : index
    %2 = vector.load %arg2[%c8, %c0_3] : memref<144x128xf32, #tpu.memory_space<vmem>>, vector<1x128xf32>
    %cst = arith.constant dense<0.000000e+00> : vector<8x128xf32>
    %3 = tpu.matmul %0, %1, %cst {dimension_numbers = #tpu.dot_dimension_numbers<[1], [0], [0], [1], [0, 0, 1, 1], [], []>} : vector<8x8xf32>, vector<8x128xf32>, vector<8x128xf32> -> vector<8x128xf32>
    %4 = vector.broadcast %2 : vector<1x128xf32> to vector<8x128xf32>
    %5 = arith.addf %3, %4 : vector<8x128xf32>
    %cst_4 = arith.constant 0.000000e+00 : f32
    %6 = vector.broadcast %cst_4 : f32 to vector<8x128xf32>
    %7 = arith.maximumf %5, %6 : vector<8x128xf32>
    %c16 = arith.constant 16 : index
    %c0_5 = arith.constant 0 : index
    %8 = vector.load %arg2[%c16, %c0_5] : memref<144x128xf32, #tpu.memory_space<vmem>>, vector<128x128xf32>
    %c9 = arith.constant 9 : index
    %c0_6 = arith.constant 0 : index
    %9 = vector.load %arg2[%c9, %c0_6] : memref<144x128xf32, #tpu.memory_space<vmem>>, vector<1x128xf32>
    %cst_7 = arith.constant dense<0.000000e+00> : vector<8x128xf32>
    %10 = tpu.matmul %7, %8, %cst_7 {dimension_numbers = #tpu.dot_dimension_numbers<[1], [0], [0], [1], [0, 0, 1, 1], [], []>} : vector<8x128xf32>, vector<128x128xf32>, vector<8x128xf32> -> vector<8x128xf32>
    %11 = vector.broadcast %9 : vector<1x128xf32> to vector<8x128xf32>
    %12 = arith.addf %10, %11 : vector<8x128xf32>
    %13 = math.tanh %12 : vector<8x128xf32>
    %c10 = arith.constant 10 : index
    %c0_8 = arith.constant 0 : index
    %14 = vector.load %arg2[%c10, %c0_8] : memref<144x128xf32, #tpu.memory_space<vmem>>, vector<1x128xf32>
    %c11 = arith.constant 11 : index
    %c0_9 = arith.constant 0 : index
    %15 = vector.load %arg2[%c11, %c0_9] : memref<144x128xf32, #tpu.memory_space<vmem>>, vector<1x1xf32>
    %c11_10 = arith.constant 11 : index
    %c1 = arith.constant 1 : index
    %16 = vector.load %arg2[%c11_10, %c1] : memref<144x128xf32, #tpu.memory_space<vmem>>, vector<1x1xf32>
    %17 = vector.broadcast %14 : vector<1x128xf32> to vector<8x128xf32>
    %18 = arith.mulf %13, %17 : vector<8x128xf32>
    %cst_11 = arith.constant dense<0.000000e+00> : vector<8xf32>
    %19 = vector.multi_reduction <add>, %18, %cst_11 [1] : vector<8x128xf32> to vector<8xf32>
    %20 = vector.shape_cast %19 : vector<8xf32> to vector<8x1xf32>
    %21 = vector.broadcast %15 : vector<1x1xf32> to vector<8x1xf32>
    %22 = arith.addf %20, %21 : vector<8x1xf32>
    %23 = math.tanh %22 : vector<8x1xf32>
    %cst_12 = arith.constant 3.000000e+00 : f32
    %24 = vector.broadcast %cst_12 : f32 to vector<8x1xf32>
    %25 = arith.mulf %24, %23 : vector<8x1xf32>
    %26 = math.exp %16 : vector<1x1xf32>
    %27 = vector.extract_strided_slice %0 {offsets = [0, 3], sizes = [8, 1], strides = [1, 1]} : vector<8x8xf32> to vector<8x1xf32>
    %28 = vector.broadcast %26 : vector<1x1xf32> to vector<8x1xf32>
    %29 = arith.mulf %28, %27 : vector<8x1xf32>
    %30 = arith.addf %25, %29 : vector<8x1xf32>
    %31 = arith.mulf %27, %27 : vector<8x1xf32>
    %cst_13 = arith.constant -5.000000e-01 : f32
    %32 = vector.broadcast %cst_13 : f32 to vector<8x1xf32>
    %33 = arith.mulf %32, %31 : vector<8x1xf32>
    %34 = vector.broadcast %16 : vector<1x1xf32> to vector<8x1xf32>
    %35 = arith.subf %33, %34 : vector<8x1xf32>
    %cst_14 = arith.constant 0.918938517 : f32
    %36 = vector.broadcast %cst_14 : f32 to vector<8x1xf32>
    %37 = arith.subf %35, %36 : vector<8x1xf32>
    %38 = tpu.iota {dimensions = array<i32: 1>} : vector<8x128xi32>
    %c0_i32 = arith.constant 0 : i32
    %39 = vector.broadcast %c0_i32 : i32 to vector<8x128xi32>
    %40 = arith.cmpi eq, %38, %39 : vector<8x128xi32>
    %c1_i32 = arith.constant 1 : i32
    %41 = vector.broadcast %c1_i32 : i32 to vector<8x128xi32>
    %42 = arith.cmpi eq, %38, %41 : vector<8x128xi32>
    %cst_15 = arith.constant 0.000000e+00 : f32
    %43 = vector.shape_cast %37 : vector<8x1xf32> to vector<8x1xf32>
    %44 = vector.broadcast %43 : vector<8x1xf32> to vector<8x128xf32>
    %45 = vector.broadcast %cst_15 : f32 to vector<8x128xf32>
    %46 = arith.select %42, %44, %45 : vector<8x128xi1>, vector<8x128xf32>
    %47 = vector.shape_cast %30 : vector<8x1xf32> to vector<8x1xf32>
    %48 = vector.broadcast %47 : vector<8x1xf32> to vector<8x128xf32>
    %49 = arith.select %40, %48, %46 : vector<8x128xi1>, vector<8x128xf32>
    %c0_16 = arith.constant 0 : index
    %c0_17 = arith.constant 0 : index
    %50 = vector.load %arg3[%c0_16, %c0_17] : memref<8x128xf32, #tpu.memory_space<vmem>>, vector<8x128xf32>
    tpu.vector_store %arg3[%c0_16, %c0_17], %49 {strides = array<i32>} : memref<8x128xf32, #tpu.memory_space<vmem>>, vector<8x128xf32>,
    return
  }
  func.func @transform_0(%arg0: i32) -> (i32, i32) {
    %c0_i32 = arith.constant 0 : i32
    %c0_i32_0 = arith.constant 0 : i32
    return %arg0, %c0_i32 : i32, i32
  }
  func.func @transform_1(%arg0: i32) -> (i32, i32) {
    %c0_i32 = arith.constant 0 : i32
    %c0_i32_0 = arith.constant 0 : i32
    %c0_i32_1 = arith.constant 0 : i32
    return %c0_i32, %c0_i32_0 : i32, i32
  }
  func.func @transform_2(%arg0: i32) -> (i32, i32) {
    %c0_i32 = arith.constant 0 : i32
    %c0_i32_0 = arith.constant 0 : i32
    return %arg0, %c0_i32 : i32, i32
  }
}

</mosaic_0001>

<bundles_post_ra>
// kernel: reinforce_forward_batched.1
= control target key start
LH: loop header
LB: loop body
LE: loop exit
PB: predicated region body
PF: predicated region fallthrough
CT: control target
= control target key end

     0   :  { %7 = vsyncpa [#allocation3], 0  ;;  %s392_s9 = smov [#allocation2]   ;;  %s442_s0 = inlined_call_operand.vmem [shape: f32[8,8], index: 0, kind: input, shape index: {}]   ;;  %s443_s1 = inlined_call_operand.hbm [shape: f32[144,128], index: 1, kind: input, shape index: {}]   ;;  %s444_s2 = inlined_call_operand.vmem [shape: f32[8,128], index: 2, kind: output, shape index: {}]  }
   0x1   :  { %s15_s10 = sshll.u32 %s392_s9, 4  ;;  %s368_s13 = scalar_lea.hbm %s443_s1, 2304  ;;  %s16_s10 = int_to_ptr.vmem [resolvable:$true] %s15_s10 }
   0x2   :  { %p369_p0 = scmp.ne.s32.totalorder %s443_s1, %s368_s13  ;;  %p372_p1 = scmp.lt.u32.totalorder %s368_s13, %s443_s1 }
   0x4   :  { %p374_p2 = pnand %p372_p1, %p369_p0 }
   0x6   :  { %377 = shalt.err (!%p374_p2)
}
   0x7   :  { %s378_s18 = scalar_lea.vmem %s16_s10, 2304  ;;  %p383_p4 = scmp.lt.s32.totalorder %s16_s10, %s16_s10 }
   0x8   :  { %p379_p3 = scmp.ne.s32.totalorder %s16_s10, %s378_s18  ;;  %p384_p5 = scmp.lt.s32.totalorder %s378_s18, %s378_s18 }
   0xa   :  { %p385_p6 = por %p384_p5, %p383_p4 }
   0xc   :  { %p386_p7 = pnand %p385_p6, %p379_p3 }
   0xe   :  { %389 = shalt.err (!%p386_p7)
}
   0xf   :  { %s393_s19 = smov 128   ;;  %s394_s20 = smov 8  }
  0x10   :  { %21 = dma.hbm_to_vmem [thread:$0]  %s443_s1, 2304, %s16_s10, [#allocation3], %s393_s19, %s393_s19, %s394_s20  }
  0x11   :  { %390 = dma.done.wait [#allocation3], 2304  }
  0x12   :  { %391 = vsyncadd [#allocation3], 4294964992  ;;  %v395_v0 = vmov 0.0   ;;  %vm396_vm0 = vmmov 0   ;;  %v397_v1 = vmov 0.0|0.0   ;;  %vm32_vm1 = vcmask 64512  }
  0x13   :  { %284 = vmatprep.subr.mxu0 %v395_v0  ;;  %286 = vmatprep.mubr.msk.f32.mxu0 %vm396_vm0, %v395_v0  ;;  %v26_v2 = vld [vmem:[#allocation2] sm:$0xff]  ;;  %v107_v4 = vld [vmem:[#allocation2 + $0x10] sm:$0xff]  ;;  %v108_v5 = vld [vmem:[#allocation2 + $0x18] sm:$0xff]  ;;  %v208_v34 = vlaneseq  ;;  %s399_s1 = smov 2   ;;  %s400_s25 = smov 127   ;;  %v401_v52 = vmov 3  }
  0x14   :  { %324 = vmatprep.subr.bf16.mxu1 %v397_v1  ;;  %321 = vmatprep.mubr.msk.f32.mxu1 %vm396_vm0, %v395_v0  ;;  %v433_v3 = vld [vmem:[%s442_s0] sm:$0xff]  ;;  %v110_v7 = vld [vmem:[#allocation2 + $0x28] sm:$0xff]  ;;  %v325_v8 = vpack.c.bf16 %v108_v5, %v107_v4  ;;  %v111_v10 = vld [vmem:[#allocation2 + $0x30] sm:$0xff]  ;;  %s398_s0 = smov 126   ;;  %v402_v56 = vmov 0  }
  0x15   :  { %285 = vmatpush3.msra.mxu0 %v26_v2  ;;  %v109_v6 = vld [vmem:[#allocation2 + $0x20] sm:$0xff]  ;;  %v112_v11 = vld [vmem:[#allocation2 + $0x38] sm:$0xff]  ;;  %v114_v14 = vld [vmem:[#allocation2 + $0x48] sm:$0xff]  ;;  %221 = vrot.lane.b32.xlu0 %v433_v3, %s398_s0  ;;  %v209_v36 = vshrl.u32 %v208_v34, 7  ;;  %v230_v50 = vmul.f32 %v433_v3, %v433_v3  ;;  %v239_v63 = vand.u32 127, %v208_v34 }
  0x16   :  { %287 = vmatmul.mubr.msk.f32.vlgmr.msra.gmra.mrb[0].mxu0 %vm32_vm1, %v433_v3  ;;  %326 = vmatpush3.bf16.msra.mxu1 %v325_v8  ;;  %v328_v9 = vpack.c.bf16 %v110_v7, %v109_v6  ;;  %v331_v12 = vpack.c.bf16 %v112_v11, %v111_v10  ;;  %v113_v13 = vld [vmem:[#allocation2 + $0x40] sm:$0xff]  ;;  %v115_v16 = vld [vmem:[#allocation2 + $0x50] sm:$0xff]  ;;  %v116_v17 = vld [vmem:[#allocation2 + $0x58] sm:$0xff] }
  0x17   :  { %327 = vmatprep.subr.bf16.mxu1 %v397_v1  ;;  %v334_v15 = vpack.c.bf16 %v114_v14, %v113_v13  ;;  %v337_v18 = vpack.c.bf16 %v116_v17, %v115_v16  ;;  %v117_v19 = vld [vmem:[#allocation2 + $0x60] sm:$0xff]  ;;  %v118_v20 = vld [vmem:[#allocation2 + $0x68] sm:$0xff]  ;;  %v119_v22 = vld [vmem:[#allocation2 + $0x70] sm:$0xff]  ;;  %v210_v37 = vsub.s32 0, %v209_v36  ;;  %359 = vset.pattern.permute.xlu1 %v401_v52  ;;  %v231_v53 = vmul.f32 -0.5, %v230_v50 }
  0x18   :  { %v340_v21 = vpack.c.bf16 %v118_v20, %v117_v19  ;;  %v120_v23 = vld [vmem:[#allocation2 + $0x78] sm:$0xff]  ;;  %v121_v25 = vld [vmem:[#allocation2 + $0x80] sm:$0xff]  ;;  %v122_v26 = vld [vmem:[#allocation2 + $0x88] sm:$0xff]  ;;  %361 = vset.pattern.permute.xlu0 %v402_v56  ;;  %vm241_vm2 = vcmp.eq.s32.totalorder %v239_v63, 1  ;;  %vm240_vm3 = vcmp.eq.s32.totalorder %v239_v63, 0 }
  0x19   :  { %v343_v24 = vpack.c.bf16 %v120_v23, %v119_v22  ;;  %v346_v27 = vpack.c.bf16 %v122_v26, %v121_v25  ;;  %v260_v28 = vld [vmem:[#allocation2 + $0x8] ss:$0 sm:$0xff]  ;;  %v200_v33 = vld [vmem:[#allocation2 + $0xb] sm:$0x1]  ;;  %v262_v43 = vld [vmem:[#allocation2 + $0x9] ss:$0 sm:$0xff] }
  0x1a   :  { %329 = vmatpush3.bf16.msra.mxu1 %v328_v9  ;;  %v215_v35 = vmul.f32 1.442695, %v200_v33  ;;  %v211_v38 = vrot.slane %v200_v33, %v210_v37  ;;  %v263_v47 = vld [vmem:[#allocation2 + $0xa] ss:$0 sm:$0xff] }
  0x1b   :  { %330 = vmatprep.subr.bf16.mxu1 %v397_v1 }
  0x1c   :  { %362 = vpow2.f32 %v215_v35  ;;  %233 = vrot.lane.b32.xlu1 %v211_v38, %s399_s1 }
  0x1e   :  { %332 = vmatpush3.bf16.msra.mxu1 %v331_v12 }
  0x1f   :  { %333 = vmatprep.subr.bf16.mxu1 %v397_v1 }
  0x22   :  { %335 = vmatpush3.bf16.msra.mxu1 %v334_v15 }
  0x23   :  { %336 = vmatprep.subr.bf16.mxu1 %v397_v1 }
  0x26   :  { %338 = vmatpush3.bf16.msra.mxu1 %v337_v18  ;;  %v363_v39 = vpop.eup %362 }
  0x27   :  { %339 = vmatprep.subr.bf16.mxu1 %v397_v1  ;;  %v220_v41 = vrot.slane %v363_v39, %v210_v37 }
  0x2a   :  { %341 = vmatpush3.bf16.msra.mxu1 %v340_v21 }
  0x2b   :  { %342 = vmatprep.subr.bf16.mxu1 %v397_v1 }
  0x2e   :  { %344 = vmatpush3.bf16.msra.mxu1 %v343_v24 }
  0x2f   :  { %345 = vmatprep.subr.bf16.mxu1 %v397_v1 }
  0x32   :  { %347 = vmatpush3.bf16.msra.mxu1 %v346_v27 }
  0x87   :  { %v222_v40 = vpop.permute.xlu0 %221 }
  0x88   :  { %v224_v42 = vmul.f32 %v222_v40, %v220_v41 }
  0x8a   :  { %226 = vrot.lane.b32.xlu1 %v224_v42, %s400_s25 }
  0x8e   :  { %v234_v51 = vpop.permute.xlu1 %233 }
  0x8f   :  { %v236_v54 = vsub.f32 %v231_v53, %v234_v51 }
  0x91   :  { %v264_v55 = vadd.f32 -0.9189385, %v236_v54 }
  0x93   :  { %244 = vperm.xlu1 %359, %v264_v55  }
  0x97   :  { %360 = vset.pattern.permute.xlu1 %v402_v56 }
  0xe9   :  { %v102_v29 = vpop.f32.mrb[0].mxu0 }
  0xea   :  { %v103_v30 = vadd.f32 %v260_v28, %v102_v29  ;;  %v288_v31 = vpop.f32.mrb[1].mxu0 }
  0xec   :  { %v106_v32 = vmax.f32 %v103_v30, 0.0 }
  0xee   :  { %322 = vmatmul.mubr.f32.vlgmr.msra.gmra.mrb[0].mxu1 %v106_v32 }
  0xfc   :  { %v227_v60 = vpop.permute.xlu1 %226 }
 0x112   :  { %v245_v0 = vpop.permute.xlu1 %244 }
 0x113   :  { %v247_v1 = vsel %vm241_vm2, %v245_v0, 0.0 }
 0x1c1   :  { %v194_v44 = vpop.f32.mrb[0].mxu1 }
 0x1c2   :  { %v195_v45 = vadd.f32 %v262_v43, %v194_v44  ;;  %v323_v46 = vpop.f32.mrb[1].mxu1 }
 0x1c4   :  { %364 = vtanh.f32 %v195_v45 }
 0x1ce   :  { %v365_v48 = vpop.eup %364 }
 0x1cf   :  { %v205_v49 = vmul.f32 %v365_v48, %v263_v47 }
 0x1d1   :  { %206 = vadd.xlane.f32.xlu0 %v205_v49 }
 0x25e   :  { %v207_v57 = vpop.xlane.xlu0 %206 }
 0x25f   :  { %v212_v58 = vadd.f32 %v211_v38, %v207_v57 }
 0x261   :  { %366 = vtanh.f32 %v212_v58 }
 0x26b   :  { %v367_v59 = vpop.eup %366 }
 0x26c   :  { %v214_v61 = vmul.f32 3.0, %v367_v59 }
 0x26e   :  { %v229_v62 = vadd.f32 %v227_v60, %v214_v61 }
 0x270   :  { %250 = vperm.xlu1 %360, %v229_v62  }
 0x2ef   :  { %v251_v2 = vpop.permute.xlu1 %250 }
 0x2f0   :  { %v253_v3 = vsel %vm240_vm3, %v251_v2, %v247_v1 }
 0x2f1   :  { %254 = vst [vmem:[%s444_s2] sm:$0xff] %v253_v3 }
 0x2f2   :  { %259 = vsyncpa [#allocation3], 1 }

</bundles_post_ra>
